<compile_context>
chip_gen: v7x
topology: tpu7x:2x2x1
jax: 0.10.0
libtpu: 0.0.40
codegen_flags: <defaults>
</compile_context>

<pallas_src>
import jax
import jax.numpy as jnp
from jax.experimental import pallas as pl
from jax.experimental.pallas import tpu as pltpu

LANES = 128          # lane-padded width of x (lanes [0:D)) and of h/c (lanes [0:H))
HALF = 64            # per-gate slot inside a packed gate block (requires hidden <= 64)
NCOL = 2 * LANES     # packed gate columns: block0 = [ i | f ], block1 = [ g | o ]


def make_lstm_fc_kernel(T, B):
    """Build the LSTM+fc kernel for static (T, B)."""

    def kernel(x_ref, w_ih_ref, w_hh_ref, b_ref, w_fc_ref, b_fc_ref, out_ref):
        # x_ref:    [T*B, LANES] f32, time-major; x_t in lanes [0:D), zeros elsewhere
        # w_ih_ref: [LANES, NCOL] f32   packed + prescaled input weights
        # w_hh_ref: [LANES, NCOL] bf16  packed + prescaled recurrent weights
        # b_ref:    [1, NCOL]     f32   packed + prescaled bias (b_ih + b_hh)
        # w_fc_ref: [LANES, O]    f32   fc weights, live rows [0:H)
        # b_fc_ref: [1, O]        f32
        # out_ref:  [B, O]        f32

        # --- Off-critical-path: input projection + bias for ALL timesteps. ---
        xw = (
            jnp.dot(x_ref[...], w_ih_ref[...], preferred_element_type=jnp.float32)
            + b_ref[...]
        )  # (T*B, NCOL)

        # Constant lane mask for the tanh (g) gate columns; hoisted out of the
        # loop (JAX does not CSE iota/broadcast and the body is fully unrolled).
        lane = jax.lax.broadcasted_iota(jnp.int32, (B, NCOL), 1)
        is_tanh_gate = (lane >= LANES) & (lane < LANES + HALF)

        h = jnp.zeros((B, LANES), jnp.float32)
        c = jnp.zeros((B, LANES), jnp.float32)

        # Fully unrolled recurrence (static indices; T is small).
        for t in range(T):
            # Per-step critical path: one bf16 MXU dot against the packed W_hh.
            z = xw[t * B:(t + 1) * B, :] + jnp.dot(
                h.astype(jnp.bfloat16), w_hh_ref[...],
                preferred_element_type=jnp.float32,
            )  # (B, NCOL) f32

            # One tanh pass over both packed blocks; sigmoid gates were
            # prescaled by 0.5 so sigmoid(z) = 0.5 * tanh(z/2) + 0.5.
            th = jnp.tanh(z)
            act = jnp.where(is_tanh_gate, th, 0.5 * th + 0.5)

            blk0 = act[:, :LANES]                   # [ i | f ]  (128-aligned slice)
            blk1 = act[:, LANES:]                   # [ g | o ]
            i_g = blk0                              # i already on lanes [0:H)
            f_g = pltpu.roll(blk0, HALF, axis=1)    # bring f onto lanes [0:H)  (XLU)
            g_g = blk1                              # g already on lanes [0:H)
            o_g = pltpu.roll(blk1, HALF, axis=1)    # bring o onto lanes [0:H)  (XLU)

            c = f_g * c + i_g * g_g
            h = o_g * jnp.tanh(c)

        # final_out = fc(lstm_out[:, -1, :]); w_fc rows [H:) are zero, so junk
        # in padded h lanes never reaches the output.
        out_ref[...] = (
            jnp.dot(h, w_fc_ref[...], preferred_element_type=jnp.float32)
            + b_fc_ref[...]
        )

    return kernel


def avsync_forward(impedance, activity, params):
    """impedance: [B, T, Di], activity: [B, T, Da]  ->  [B, output_size]."""
    x = jnp.concatenate([impedance, activity], axis=-1).astype(jnp.float32)  # [B,T,D]
    B, T, D = x.shape
    O = params["w_fc_pad"].shape[1]

    # Wrapper-side layout plumbing (tiny arrays): lane-pad x to 128 and flatten
    # to a time-major (T*B, 128) slab so the in-kernel projection is one matmul.
    x_pad = jnp.pad(x, ((0, 0), (0, 0), (0, LANES - D)))
    x_tm = jnp.transpose(x_pad, (1, 0, 2)).reshape(T * B, LANES)

    vmem = lambda: pl.BlockSpec(memory_space=pltpu.MemorySpace.VMEM)
    # Total VMEM footprint ~220 KiB -> gridless single invocation is fine on
    # v5e/v6e/v7x.  If B/T grow: add a "parallel" batch grid axis (v7x has two
    # TensorCores) and/or chunk time along an "arbitrary" axis with h/c scratch.
    return pl.pallas_call(
        make_lstm_fc_kernel(T, B),
        out_shape=jax.ShapeDtypeStruct((B, O), jnp.float32),
        in_specs=[vmem() for _ in range(6)],
        out_specs=vmem(),
    )(x_tm, params["w_ih_pack"], params["w_hh_pack"], params["b_pack"],
      params["w_fc_pad"], params["b_fc_pad"])


def init_params(key, input_size=11, hidden_size=50, output_size=1):
    """Deterministic synthetic params matching nn.LSTM / nn.Linear shapes, plus
    the packed / prescaled layout consumed by the kernel."""
    D, H, O = input_size, hidden_size, output_size
    assert D <= LANES, "x must fit in one 128-lane block"
    assert H <= HALF, "two gates must pack into one 128-lane block"

    ks = jax.random.split(key, 6)
    bound = 1.0 / jnp.sqrt(hidden_size)
    u = lambda k, shape: jax.random.uniform(k, shape, jnp.float32, -bound, bound)
    w_ih = u(ks[0], (4 * H, D))      # PyTorch: lstm.weight_ih_l0
    w_hh = u(ks[1], (4 * H, H))      # PyTorch: lstm.weight_hh_l0
    b_ih = u(ks[2], (4 * H,))        # PyTorch: lstm.bias_ih_l0
    b_hh = u(ks[3], (4 * H,))        # PyTorch: lstm.bias_hh_l0
    w_fc = u(ks[4], (O, H))          # PyTorch: fc.weight
    b_fc = u(ks[5], (O,))            # PyTorch: fc.bias

    # Packed column layout (PyTorch gate order i, f, g, o):
    #   i -> cols [0,   0+H)   sigmoid, prescaled by 0.5
    #   f -> cols [64,  64+H)  sigmoid, prescaled by 0.5
    #   g -> cols [128, 128+H) tanh,    unscaled
    #   o -> cols [192, 192+H) sigmoid, prescaled by 0.5
    col_off = (0, HALF, LANES, LANES + HALF)
    col_scale = (0.5, 0.5, 1.0, 0.5)
    w_ih_pack = jnp.zeros((LANES, NCOL), jnp.float32)
    w_hh_pack = jnp.zeros((LANES, NCOL), jnp.float32)
    b_pack = jnp.zeros((1, NCOL), jnp.float32)
    for g in range(4):
        c0, s = col_off[g], col_scale[g]
        rows = slice(g * H, (g + 1) * H)
        w_ih_pack = w_ih_pack.at[0:D, c0:c0 + H].set(s * w_ih[rows, :].T)
        w_hh_pack = w_hh_pack.at[0:H, c0:c0 + H].set(s * w_hh[rows, :].T)
        b_pack = b_pack.at[0, c0:c0 + H].set(s * (b_ih[rows] + b_hh[rows]))

    w_fc_pad = jnp.zeros((LANES, O), jnp.float32).at[0:H, :].set(w_fc.T)
    b_fc_pad = b_fc.reshape(1, O)

    return {
        # packed kernel params (recurrent weight in bf16: the MXU operand dtype)
        "w_ih_pack": w_ih_pack,
        "w_hh_pack": w_hh_pack.astype(jnp.bfloat16),
        "b_pack": b_pack,
        "w_fc_pad": w_fc_pad,
        "b_fc_pad": b_fc_pad,
        # plain params for the pure-JAX f32 reference
        "w_ih_t": w_ih.T, "w_hh_t": w_hh.T,
        "b": (b_ih + b_hh).reshape(1, 4 * H),
        "w_fc_t": w_fc.T, "b_fc": b_fc.reshape(1, O),
    }


def avsync_reference(impedance, activity, params):
    """Pure-JAX f32 reference (lax.scan LSTM) for correctness checking."""
    x = jnp.concatenate([impedance, activity], axis=-1).astype(jnp.float32)
    B = x.shape[0]
    H = params["w_hh_t"].shape[0]

    def step(carry, x_t):
        h, c = carry
        gates = x_t @ params["w_ih_t"] + h @ params["w_hh_t"] + params["b"]
        i = jax.nn.sigmoid(gates[:, 0 * H:1 * H])
        f = jax.nn.sigmoid(gates[:, 1 * H:2 * H])
        g = jnp.tanh(gates[:, 2 * H:3 * H])
        o = jax.nn.sigmoid(gates[:, 3 * H:4 * H])
        c = f * c + i * g
        h = o * jnp.tanh(c)
        return (h, c), None

    h0 = jnp.zeros((B, H), jnp.float32)
    (h, _), _ = jax.lax.scan(step, (h0, h0), jnp.transpose(x, (1, 0, 2)))
    return h @ params["w_fc_t"] + params["b_fc"]


if __name__ == "__main__":
    key = jax.random.PRNGKey(0)
    k_imp, k_act, k_par = jax.random.split(key, 3)

    B, T = 2, 8
    IMP_DIM, ACT_DIM = 6, 5          # concat -> input_size = 11
    impedance = jax.random.normal(k_imp, (B, T, IMP_DIM), jnp.float32)
    activity = jax.random.normal(k_act, (B, T, ACT_DIM), jnp.float32)

    params = init_params(k_par, input_size=IMP_DIM + ACT_DIM,
                         hidden_size=50, output_size=1)

    out = avsync_forward(impedance, activity, params)
    out = jax.block_until_ready(out)

    ref = avsync_reference(impedance, activity, params)
    assert out.shape == (B, 1)
    # Tolerance relaxed vs a pure-f32 kernel: the recurrent weight / h operand
    # are bf16 on the MXU (f32 accumulation), per the performance review.
    assert jnp.allclose(out, ref, atol=2e-2, rtol=2e-2), (out, ref)

    print("KERNEL_OK")
</pallas_src>

<mosaic_0001>
module attributes {stable_mosaic.version = 11 : i64} {
  func.func @kernel(%arg0: memref<16x128xf32, #tpu.memory_space<vmem>>, %arg1: memref<128x256xf32, #tpu.memory_space<vmem>>, %arg2: memref<128x256xbf16, #tpu.memory_space<vmem>>, %arg3: memref<1x256xf32, #tpu.memory_space<vmem>>, %arg4: memref<128x1xf32, #tpu.memory_space<vmem>>, %arg5: memref<1x1xf32, #tpu.memory_space<vmem>>, %arg6: memref<2x1xf32, #tpu.memory_space<vmem>>) attributes {dimension_semantics = [], scalar_prefetch = 0 : i64, scratch_operands = 0 : i64, tpu.core_type = #tpu.core_type<tc>} {
    %c0 = arith.constant 0 : index
    %c0_0 = arith.constant 0 : index
    %0 = vector.load %arg0[%c0, %c0_0] : memref<16x128xf32, #tpu.memory_space<vmem>>, vector<16x128xf32>
    %c0_1 = arith.constant 0 : index
    %c0_2 = arith.constant 0 : index
    %1 = vector.load %arg1[%c0_1, %c0_2] : memref<128x256xf32, #tpu.memory_space<vmem>>, vector<128x256xf32>
    %cst = arith.constant dense<0.000000e+00> : vector<16x256xf32>
    %2 = tpu.matmul %0, %1, %cst {dimension_numbers = #tpu.dot_dimension_numbers<[1], [0], [0], [1], [0, 0, 1, 1], [], []>} : vector<16x128xf32>, vector<128x256xf32>, vector<16x256xf32> -> vector<16x256xf32>
    %c0_3 = arith.constant 0 : index
    %c0_4 = arith.constant 0 : index
    %3 = vector.load %arg3[%c0_3, %c0_4] : memref<1x256xf32, #tpu.memory_space<vmem>>, vector<1x256xf32>
    %4 = vector.broadcast %3 : vector<1x256xf32> to vector<16x256xf32>
    %5 = arith.addf %2, %4 : vector<16x256xf32>
    %6 = tpu.iota {dimensions = array<i32: 1>} : vector<2x256xi32>
    %c128_i32 = arith.constant 128 : i32
    %7 = vector.broadcast %c128_i32 : i32 to vector<2x256xi32>
    %8 = arith.cmpi sge, %6, %7 : vector<2x256xi32>
    %c192_i32 = arith.constant 192 : i32
    %9 = vector.broadcast %c192_i32 : i32 to vector<2x256xi32>
    %10 = arith.cmpi slt, %6, %9 : vector<2x256xi32>
    %11 = arith.andi %8, %10 : vector<2x256xi1>
    %cst_5 = arith.constant 0.000000e+00 : f32
    %12 = vector.broadcast %cst_5 : f32 to vector<2x128xf32>
    %cst_6 = arith.constant 0.000000e+00 : f32
    %13 = vector.broadcast %cst_6 : f32 to vector<2x128xf32>
    %14 = vector.extract_strided_slice %5 {offsets = [0, 0], sizes = [2, 256], strides = [1, 1]} : vector<16x256xf32> to vector<2x256xf32>
    %15 = arith.truncf %12 : vector<2x128xf32> to vector<2x128xbf16>
    %c0_7 = arith.constant 0 : index
    %c0_8 = arith.constant 0 : index
    %16 = vector.load %arg2[%c0_7, %c0_8] : memref<128x256xbf16, #tpu.memory_space<vmem>>, vector<128x256xbf16>
    %cst_9 = arith.constant dense<0.000000e+00> : vector<2x256xf32>
    %17 = tpu.matmul %15, %16, %cst_9 {dimension_numbers = #tpu.dot_dimension_numbers<[1], [0], [0], [1], [0, 0, 1, 1], [], []>} : vector<2x128xbf16>, vector<128x256xbf16>, vector<2x256xf32> -> vector<2x256xf32>
    %18 = arith.addf %14, %17 : vector<2x256xf32>
    %19 = math.tanh %18 : vector<2x256xf32>
    %cst_10 = arith.constant 5.000000e-01 : f32
    %20 = vector.broadcast %cst_10 : f32 to vector<2x256xf32>
    %21 = arith.mulf %20, %19 : vector<2x256xf32>
    %cst_11 = arith.constant 5.000000e-01 : f32
    %22 = vector.broadcast %cst_11 : f32 to vector<2x256xf32>
    %23 = arith.addf %21, %22 : vector<2x256xf32>
    %24 = arith.select %11, %19, %23 : vector<2x256xi1>, vector<2x256xf32>
    %25 = vector.extract_strided_slice %24 {offsets = [0, 0], sizes = [2, 128], strides = [1, 1]} : vector<2x256xf32> to vector<2x128xf32>
    %26 = vector.extract_strided_slice %24 {offsets = [0, 128], sizes = [2, 128], strides = [1, 1]} : vector<2x256xf32> to vector<2x128xf32>
    %c64_i32 = arith.constant 64 : i32
    %27 = tpu.dynamic_rotate %25 by %c64_i32 dim 1 : vector<2x128xf32>, i32 -> vector<2x128xf32>
    %c64_i32_12 = arith.constant 64 : i32
    %28 = tpu.dynamic_rotate %26 by %c64_i32_12 dim 1 : vector<2x128xf32>, i32 -> vector<2x128xf32>
    %29 = arith.mulf %27, %13 : vector<2x128xf32>
    %30 = arith.mulf %25, %26 : vector<2x128xf32>
    %31 = arith.addf %29, %30 : vector<2x128xf32>
    %32 = math.tanh %31 : vector<2x128xf32>
    %33 = arith.mulf %28, %32 : vector<2x128xf32>
    %34 = vector.extract_strided_slice %5 {offsets = [2, 0], sizes = [2, 256], strides = [1, 1]} : vector<16x256xf32> to vector<2x256xf32>
    %35 = arith.truncf %33 : vector<2x128xf32> to vector<2x128xbf16>
    %c0_13 = arith.constant 0 : index
    %c0_14 = arith.constant 0 : index
    %36 = vector.load %arg2[%c0_13, %c0_14] : memref<128x256xbf16, #tpu.memory_space<vmem>>, vector<128x256xbf16>
    %cst_15 = arith.constant dense<0.000000e+00> : vector<2x256xf32>
    %37 = tpu.matmul %35, %36, %cst_15 {dimension_numbers = #tpu.dot_dimension_numbers<[1], [0], [0], [1], [0, 0, 1, 1], [], []>} : vector<2x128xbf16>, vector<128x256xbf16>, vector<2x256xf32> -> vector<2x256xf32>
    %38 = arith.addf %34, %37 : vector<2x256xf32>
    %39 = math.tanh %38 : vector<2x256xf32>
    %cst_16 = arith.constant 5.000000e-01 : f32
    %40 = vector.broadcast %cst_16 : f32 to vector<2x256xf32>
    %41 = arith.mulf %40, %39 : vector<2x256xf32>
    %cst_17 = arith.constant 5.000000e-01 : f32
    %42 = vector.broadcast %cst_17 : f32 to vector<2x256xf32>
    %43 = arith.addf %41, %42 : vector<2x256xf32>
    %44 = arith.select %11, %39, %43 : vector<2x256xi1>, vector<2x256xf32>
    %45 = vector.extract_strided_slice %44 {offsets = [0, 0], sizes = [2, 128], strides = [1, 1]} : vector<2x256xf32> to vector<2x128xf32>
    %46 = vector.extract_strided_slice %44 {offsets = [0, 128], sizes = [2, 128], strides = [1, 1]} : vector<2x256xf32> to vector<2x128xf32>
    %c64_i32_18 = arith.constant 64 : i32
    %47 = tpu.dynamic_rotate %45 by %c64_i32_18 dim 1 : vector<2x128xf32>, i32 -> vector<2x128xf32>
    %c64_i32_19 = arith.constant 64 : i32
    %48 = tpu.dynamic_rotate %46 by %c64_i32_19 dim 1 : vector<2x128xf32>, i32 -> vector<2x128xf32>
    %49 = arith.mulf %47, %31 : vector<2x128xf32>
    %50 = arith.mulf %45, %46 : vector<2x128xf32>
    %51 = arith.addf %49, %50 : vector<2x128xf32>
    %52 = math.tanh %51 : vector<2x128xf32>
    %53 = arith.mulf %48, %52 : vector<2x128xf32>
    %54 = vector.extract_strided_slice %5 {offsets = [4, 0], sizes = [2, 256], strides = [1, 1]} : vector<16x256xf32> to vector<2x256xf32>
    %55 = arith.truncf %53 : vector<2x128xf32> to vector<2x128xbf16>
    %c0_20 = arith.constant 0 : index
    %c0_21 = arith.constant 0 : index
    %56 = vector.load %arg2[%c0_20, %c0_21] : memref<128x256xbf16, #tpu.memory_space<vmem>>, vector<128x256xbf16>
    %cst_22 = arith.constant dense<0.000000e+00> : vector<2x256xf32>
    %57 = tpu.matmul %55, %56, %cst_22 {dimension_numbers = #tpu.dot_dimension_numbers<[1], [0], [0], [1], [0, 0, 1, 1], [], []>} : vector<2x128xbf16>, vector<128x256xbf16>, vector<2x256xf32> -> vector<2x256xf32>
    %58 = arith.addf %54, %57 : vector<2x256xf32>
    %59 = math.tanh %58 : vector<2x256xf32>
    %cst_23 = arith.constant 5.000000e-01 : f32
    %60 = vector.broadcast %cst_23 : f32 to vector<2x256xf32>
    %61 = arith.mulf %60, %59 : vector<2x256xf32>
    %cst_24 = arith.constant 5.000000e-01 : f32
    %62 = vector.broadcast %cst_24 : f32 to vector<2x256xf32>
    %63 = arith.addf %61, %62 : vector<2x256xf32>
    %64 = arith.select %11, %59, %63 : vector<2x256xi1>, vector<2x256xf32>
    %65 = vector.extract_strided_slice %64 {offsets = [0, 0], sizes = [2, 128], strides = [1, 1]} : vector<2x256xf32> to vector<2x128xf32>
    %66 = vector.extract_strided_slice %64 {offsets = [0, 128], sizes = [2, 128], strides = [1, 1]} : vector<2x256xf32> to vector<2x128xf32>
    %c64_i32_25 = arith.constant 64 : i32
    %67 = tpu.dynamic_rotate %65 by %c64_i32_25 dim 1 : vector<2x128xf32>, i32 -> vector<2x128xf32>
    %c64_i32_26 = arith.constant 64 : i32
    %68 = tpu.dynamic_rotate %66 by %c64_i32_26 dim 1 : vector<2x128xf32>, i32 -> vector<2x128xf32>
    %69 = arith.mulf %67, %51 : vector<2x128xf32>
    %70 = arith.mulf %65, %66 : vector<2x128xf32>
    %71 = arith.addf %69, %70 : vector<2x128xf32>
    %72 = math.tanh %71 : vector<2x128xf32>
    %73 = arith.mulf %68, %72 : vector<2x128xf32>
    %74 = vector.extract_strided_slice %5 {offsets = [6, 0], sizes = [2, 256], strides = [1, 1]} : vector<16x256xf32> to vector<2x256xf32>
    %75 = arith.truncf %73 : vector<2x128xf32> to vector<2x128xbf16>
    %c0_27 = arith.constant 0 : index
    %c0_28 = arith.constant 0 : index
    %76 = vector.load %arg2[%c0_27, %c0_28] : memref<128x256xbf16, #tpu.memory_space<vmem>>, vector<128x256xbf16>
    %cst_29 = arith.constant dense<0.000000e+00> : vector<2x256xf32>
    %77 = tpu.matmul %75, %76, %cst_29 {dimension_numbers = #tpu.dot_dimension_numbers<[1], [0], [0], [1], [0, 0, 1, 1], [], []>} : vector<2x128xbf16>, vector<128x256xbf16>, vector<2x256xf32> -> vector<2x256xf32>
    %78 = arith.addf %74, %77 : vector<2x256xf32>
    %79 = math.tanh %78 : vector<2x256xf32>
    %cst_30 = arith.constant 5.000000e-01 : f32
    %80 = vector.broadcast %cst_30 : f32 to vector<2x256xf32>
    %81 = arith.mulf %80, %79 : vector<2x256xf32>
    %cst_31 = arith.constant 5.000000e-01 : f32
    %82 = vector.broadcast %cst_31 : f32 to vector<2x256xf32>
    %83 = arith.addf %81, %82 : vector<2x256xf32>
    %84 = arith.select %11, %79, %83 : vector<2x256xi1>, vector<2x256xf32>
    %85 = vector.extract_strided_slice %84 {offsets = [0, 0], sizes = [2, 128], strides = [1, 1]} : vector<2x256xf32> to vector<2x128xf32>
    %86 = vector.extract_strided_slice %84 {offsets = [0, 128], sizes = [2, 128], strides = [1, 1]} : vector<2x256xf32> to vector<2x128xf32>
    %c64_i32_32 = arith.constant 64 : i32
    %87 = tpu.dynamic_rotate %85 by %c64_i32_32 dim 1 : vector<2x128xf32>, i32 -> vector<2x128xf32>
    %c64_i32_33 = arith.constant 64 : i32
    %88 = tpu.dynamic_rotate %86 by %c64_i32_33 dim 1 : vector<2x128xf32>, i32 -> vector<2x128xf32>
    %89 = arith.mulf %87, %71 : vector<2x128xf32>
    %90 = arith.mulf %85, %86 : vector<2x128xf32>
    %91 = arith.addf %89, %90 : vector<2x128xf32>
    %92 = math.tanh %91 : vector<2x128xf32>
    %93 = arith.mulf %88, %92 : vector<2x128xf32>
    %94 = vector.extract_strided_slice %5 {offsets = [8, 0], sizes = [2, 256], strides = [1, 1]} : vector<16x256xf32> to vector<2x256xf32>
    %95 = arith.truncf %93 : vector<2x128xf32> to vector<2x128xbf16>
    %c0_34 = arith.constant 0 : index
    %c0_35 = arith.constant 0 : index
    %96 = vector.load %arg2[%c0_34, %c0_35] : memref<128x256xbf16, #tpu.memory_space<vmem>>, vector<128x256xbf16>
    %cst_36 = arith.constant dense<0.000000e+00> : vector<2x256xf32>
    %97 = tpu.matmul %95, %96, %cst_36 {dimension_numbers = #tpu.dot_dimension_numbers<[1], [0], [0], [1], [0, 0, 1, 1], [], []>} : vector<2x128xbf16>, vector<128x256xbf16>, vector<2x256xf32> -> vector<2x256xf32>
    %98 = arith.addf %94, %97 : vector<2x256xf32>
    %99 = math.tanh %98 : vector<2x256xf32>
    %cst_37 = arith.constant 5.000000e-01 : f32
    %100 = vector.broadcast %cst_37 : f32 to vector<2x256xf32>
    %101 = arith.mulf %100, %99 : vector<2x256xf32>
    %cst_38 = arith.constant 5.000000e-01 : f32
    %102 = vector.broadcast %cst_38 : f32 to vector<2x256xf32>
    %103 = arith.addf %101, %102 : vector<2x256xf32>
    %104 = arith.select %11, %99, %103 : vector<2x256xi1>, vector<2x256xf32>
    %105 = vector.extract_strided_slice %104 {offsets = [0, 0], sizes = [2, 128], strides = [1, 1]} : vector<2x256xf32> to vector<2x128xf32>
    %106 = vector.extract_strided_slice %104 {offsets = [0, 128], sizes = [2, 128], strides = [1, 1]} : vector<2x256xf32> to vector<2x128xf32>
    %c64_i32_39 = arith.constant 64 : i32
    %107 = tpu.dynamic_rotate %105 by %c64_i32_39 dim 1 : vector<2x128xf32>, i32 -> vector<2x128xf32>
    %c64_i32_40 = arith.constant 64 : i32
    %108 = tpu.dynamic_rotate %106 by %c64_i32_40 dim 1 : vector<2x128xf32>, i32 -> vector<2x128xf32>
    %109 = arith.mulf %107, %91 : vector<2x128xf32>
    %110 = arith.mulf %105, %106 : vector<2x128xf32>
    %111 = arith.addf %109, %110 : vector<2x128xf32>
    %112 = math.tanh %111 : vector<2x128xf32>
    %113 = arith.mulf %108, %112 : vector<2x128xf32>
    %114 = vector.extract_strided_slice %5 {offsets = [10, 0], sizes = [2, 256], strides = [1, 1]} : vector<16x256xf32> to vector<2x256xf32>
    %115 = arith.truncf %113 : vector<2x128xf32> to vector<2x128xbf16>
    %c0_41 = arith.constant 0 : index
    %c0_42 = arith.constant 0 : index
    %116 = vector.load %arg2[%c0_41, %c0_42] : memref<128x256xbf16, #tpu.memory_space<vmem>>, vector<128x256xbf16>
    %cst_43 = arith.constant dense<0.000000e+00> : vector<2x256xf32>
    %117 = tpu.matmul %115, %116, %cst_43 {dimension_numbers = #tpu.dot_dimension_numbers<[1], [0], [0], [1], [0, 0, 1, 1], [], []>} : vector<2x128xbf16>, vector<128x256xbf16>, vector<2x256xf32> -> vector<2x256xf32>
    %118 = arith.addf %114, %117 : vector<2x256xf32>
    %119 = math.tanh %118 : vector<2x256xf32>
    %cst_44 = arith.constant 5.000000e-01 : f32
    %120 = vector.broadcast %cst_44 : f32 to vector<2x256xf32>
    %121 = arith.mulf %120, %119 : vector<2x256xf32>
    %cst_45 = arith.constant 5.000000e-01 : f32
    %122 = vector.broadcast %cst_45 : f32 to vector<2x256xf32>
    %123 = arith.addf %121, %122 : vector<2x256xf32>
    %124 = arith.select %11, %119, %123 : vector<2x256xi1>, vector<2x256xf32>
    %125 = vector.extract_strided_slice %124 {offsets = [0, 0], sizes = [2, 128], strides = [1, 1]} : vector<2x256xf32> to vector<2x128xf32>
    %126 = vector.extract_strided_slice %124 {offsets = [0, 128], sizes = [2, 128], strides = [1, 1]} : vector<2x256xf32> to vector<2x128xf32>
    %c64_i32_46 = arith.constant 64 : i32
    %127 = tpu.dynamic_rotate %125 by %c64_i32_46 dim 1 : vector<2x128xf32>, i32 -> vector<2x128xf32>
    %c64_i32_47 = arith.constant 64 : i32
    %128 = tpu.dynamic_rotate %126 by %c64_i32_47 dim 1 : vector<2x128xf32>, i32 -> vector<2x128xf32>
    %129 = arith.mulf %127, %111 : vector<2x128xf32>
    %130 = arith.mulf %125, %126 : vector<2x128xf32>
    %131 = arith.addf %129, %130 : vector<2x128xf32>
    %132 = math.tanh %131 : vector<2x128xf32>
    %133 = arith.mulf %128, %132 : vector<2x128xf32>
    %134 = vector.extract_strided_slice %5 {offsets = [12, 0], sizes = [2, 256], strides = [1, 1]} : vector<16x256xf32> to vector<2x256xf32>
    %135 = arith.truncf %133 : vector<2x128xf32> to vector<2x128xbf16>
    %c0_48 = arith.constant 0 : index
    %c0_49 = arith.constant 0 : index
    %136 = vector.load %arg2[%c0_48, %c0_49] : memref<128x256xbf16, #tpu.memory_space<vmem>>, vector<128x256xbf16>
    %cst_50 = arith.constant dense<0.000000e+00> : vector<2x256xf32>
    %137 = tpu.matmul %135, %136, %cst_50 {dimension_numbers = #tpu.dot_dimension_numbers<[1], [0], [0], [1], [0, 0, 1, 1], [], []>} : vector<2x128xbf16>, vector<128x256xbf16>, vector<2x256xf32> -> vector<2x256xf32>
    %138 = arith.addf %134, %137 : vector<2x256xf32>
    %139 = math.tanh %138 : vector<2x256xf32>
    %cst_51 = arith.constant 5.000000e-01 : f32
    %140 = vector.broadcast %cst_51 : f32 to vector<2x256xf32>
    %141 = arith.mulf %140, %139 : vector<2x256xf32>
    %cst_52 = arith.constant 5.000000e-01 : f32
    %142 = vector.broadcast %cst_52 : f32 to vector<2x256xf32>
    %143 = arith.addf %141, %142 : vector<2x256xf32>
    %144 = arith.select %11, %139, %143 : vector<2x256xi1>, vector<2x256xf32>
    %145 = vector.extract_strided_slice %144 {offsets = [0, 0], sizes = [2, 128], strides = [1, 1]} : vector<2x256xf32> to vector<2x128xf32>
    %146 = vector.extract_strided_slice %144 {offsets = [0, 128], sizes = [2, 128], strides = [1, 1]} : vector<2x256xf32> to vector<2x128xf32>
    %c64_i32_53 = arith.constant 64 : i32
    %147 = tpu.dynamic_rotate %145 by %c64_i32_53 dim 1 : vector<2x128xf32>, i32 -> vector<2x128xf32>
    %c64_i32_54 = arith.constant 64 : i32
    %148 = tpu.dynamic_rotate %146 by %c64_i32_54 dim 1 : vector<2x128xf32>, i32 -> vector<2x128xf32>
    %149 = arith.mulf %147, %131 : vector<2x128xf32>
    %150 = arith.mulf %145, %146 : vector<2x128xf32>
    %151 = arith.addf %149, %150 : vector<2x128xf32>
    %152 = math.tanh %151 : vector<2x128xf32>
    %153 = arith.mulf %148, %152 : vector<2x128xf32>
    %154 = vector.extract_strided_slice %5 {offsets = [14, 0], sizes = [2, 256], strides = [1, 1]} : vector<16x256xf32> to vector<2x256xf32>
    %155 = arith.truncf %153 : vector<2x128xf32> to vector<2x128xbf16>
    %c0_55 = arith.constant 0 : index
    %c0_56 = arith.constant 0 : index
    %156 = vector.load %arg2[%c0_55, %c0_56] : memref<128x256xbf16, #tpu.memory_space<vmem>>, vector<128x256xbf16>
    %cst_57 = arith.constant dense<0.000000e+00> : vector<2x256xf32>
    %157 = tpu.matmul %155, %156, %cst_57 {dimension_numbers = #tpu.dot_dimension_numbers<[1], [0], [0], [1], [0, 0, 1, 1], [], []>} : vector<2x128xbf16>, vector<128x256xbf16>, vector<2x256xf32> -> vector<2x256xf32>
    %158 = arith.addf %154, %157 : vector<2x256xf32>
    %159 = math.tanh %158 : vector<2x256xf32>
    %cst_58 = arith.constant 5.000000e-01 : f32
    %160 = vector.broadcast %cst_58 : f32 to vector<2x256xf32>
    %161 = arith.mulf %160, %159 : vector<2x256xf32>
    %cst_59 = arith.constant 5.000000e-01 : f32
    %162 = vector.broadcast %cst_59 : f32 to vector<2x256xf32>
    %163 = arith.addf %161, %162 : vector<2x256xf32>
    %164 = arith.select %11, %159, %163 : vector<2x256xi1>, vector<2x256xf32>
    %165 = vector.extract_strided_slice %164 {offsets = [0, 0], sizes = [2, 128], strides = [1, 1]} : vector<2x256xf32> to vector<2x128xf32>
    %166 = vector.extract_strided_slice %164 {offsets = [0, 128], sizes = [2, 128], strides = [1, 1]} : vector<2x256xf32> to vector<2x128xf32>
    %c64_i32_60 = arith.constant 64 : i32
    %167 = tpu.dynamic_rotate %165 by %c64_i32_60 dim 1 : vector<2x128xf32>, i32 -> vector<2x128xf32>
    %c64_i32_61 = arith.constant 64 : i32
    %168 = tpu.dynamic_rotate %166 by %c64_i32_61 dim 1 : vector<2x128xf32>, i32 -> vector<2x128xf32>
    %169 = arith.mulf %167, %151 : vector<2x128xf32>
    %170 = arith.mulf %165, %166 : vector<2x128xf32>
    %171 = arith.addf %169, %170 : vector<2x128xf32>
    %172 = math.tanh %171 : vector<2x128xf32>
    %173 = arith.mulf %168, %172 : vector<2x128xf32>
    %c0_62 = arith.constant 0 : index
    %c0_63 = arith.constant 0 : index
    %174 = vector.load %arg4[%c0_62, %c0_63] : memref<128x1xf32, #tpu.memory_space<vmem>>, vector<128x1xf32>
    %cst_64 = arith.constant dense<0.000000e+00> : vector<2x1xf32>
    %175 = tpu.matmul %173, %174, %cst_64 {dimension_numbers = #tpu.dot_dimension_numbers<[1], [0], [0], [1], [0, 0, 1, 1], [], []>} : vector<2x128xf32>, vector<128x1xf32>, vector<2x1xf32> -> vector<2x1xf32>
    %c0_65 = arith.constant 0 : index
    %c0_66 = arith.constant 0 : index
    %176 = vector.load %arg5[%c0_65, %c0_66] : memref<1x1xf32, #tpu.memory_space<vmem>>, vector<1x1xf32>
    %177 = vector.broadcast %176 : vector<1x1xf32> to vector<2x1xf32>
    %178 = arith.addf %175, %177 : vector<2x1xf32>
    %c0_67 = arith.constant 0 : index
    %c0_68 = arith.constant 0 : index
    %179 = vector.load %arg6[%c0_67, %c0_68] : memref<2x1xf32, #tpu.memory_space<vmem>>, vector<2x1xf32>
    tpu.vector_store %arg6[%c0_67, %c0_68], %178 {strides = array<i32>} : memref<2x1xf32, #tpu.memory_space<vmem>>, vector<2x1xf32>,
    return
  }
}

</mosaic_0001>

<bundles_post_ra>
// kernel: tpu_custom_call.1
= control target key start
LH: loop header
LB: loop body
LE: loop exit
PB: predicated region body
PF: predicated region fallthrough
CT: control target
= control target key end

     0   :  { %s1640_s0 = inlined_call_operand.hbm [shape: f32[16,128], index: 0, kind: input, shape index: {}]   ;;  %s1641_s1 = inlined_call_operand.hbm [shape: f32[128,256], index: 1, kind: input, shape index: {}]   ;;  %s1642_s2 = inlined_call_operand.vmem [shape: bf16[128,256], index: 2, kind: input, shape index: {}]   ;;  %s1643_s3 = inlined_call_operand.vmem [shape: f32[1,256], index: 3, kind: input, shape index: {}]   ;;  %s1644_s4 = inlined_call_operand.vmem [shape: f32[128,1], index: 4, kind: input, shape index: {}]   ;;  %s1645_s5 = inlined_call_operand.<no memory space> [shape: f32[1,1], index: 5, kind: input, shape index: {}]   ;;  %s1646_s6 = inlined_call_operand.vmem [shape: f32[2,1], index: 6, kind: output, shape index: {}]  }
   0x1   :  { %v11_v0 = vstv %s1645_s5 }
   0x2   :  { %12 = vst [vmem:[#allocation2] sm:$0x1] %v11_v0 }
   0x3   :  { %13 = vsyncpa [#allocation4], 0 }
   0x4   :  { %14 = vsyncpa [#allocation6], 0  ;;  %s1216_s23 = smov [#allocation3]   ;;  %s1168_s27 = scalar_lea.hbm %s1640_s0, 256 }
   0x5   :  { %s20_s24 = sshll.u32 %s1216_s23, 4  ;;  %p1169_p0 = scmp.ne.s32.totalorder %s1640_s0, %s1168_s27  ;;  %s21_s24 = int_to_ptr.vmem [resolvable:$true] %s20_s24 }
   0x6   :  { %p1172_p1 = scmp.lt.u32.totalorder %s1168_s27, %s1640_s0 }
   0x8   :  { %p1174_p2 = pnand %p1172_p1, %p1169_p0 }
   0xa   :  { %1177 = shalt.err (!%p1174_p2)
}
   0xb   :  { %s1178_s5 = scalar_lea.vmem %s21_s24, 256  ;;  %p1183_p4 = scmp.lt.s32.totalorder %s21_s24, %s21_s24 }
   0xc   :  { %p1179_p3 = scmp.ne.s32.totalorder %s21_s24, %s1178_s5  ;;  %p1184_p5 = scmp.lt.s32.totalorder %s1178_s5, %s1178_s5 }
   0xe   :  { %p1185_p6 = por %p1184_p5, %p1183_p4 }
  0x10   :  { %p1186_p7 = pnand %p1185_p6, %p1179_p3 }
  0x12   :  { %1189 = shalt.err (!%p1186_p7)
}
  0x13   :  { %s1217_s8 = smov 128   ;;  %s1218_s9 = smov 8  }
  0x14   :  { %26 = dma.hbm_to_vmem [thread:$0]  %s1640_s0, 256, %s21_s24, [#allocation4], %s1217_s8, %s1217_s8, %s1218_s9  }
  0x15   :  { %s1219_s12 = smov [#allocation5]   ;;  %s1190_s16 = scalar_lea.hbm %s1641_s1, 4096 }
  0x16   :  { %s32_s13 = sshll.u32 %s1219_s12, 4  ;;  %p1191_p8 = scmp.ne.s32.totalorder %s1641_s1, %s1190_s16  ;;  %s33_s13 = int_to_ptr.vmem [resolvable:$true] %s32_s13 }
  0x17   :  { %p1194_p9 = scmp.lt.u32.totalorder %s1190_s16, %s1641_s1 }
  0x19   :  { %p1196_p10 = pnand %p1194_p9, %p1191_p8 }
  0x1b   :  { %1199 = shalt.err (!%p1196_p10)
}
  0x1c   :  { %s1200_s21 = scalar_lea.vmem %s33_s13, 4096  ;;  %p1205_p12 = scmp.lt.s32.totalorder %s33_s13, %s33_s13 }
  0x1d   :  { %p1201_p11 = scmp.ne.s32.totalorder %s33_s13, %s1200_s21  ;;  %p1206_p13 = scmp.lt.s32.totalorder %s1200_s21, %s1200_s21 }
  0x1f   :  { %p1207_p0 = por %p1206_p13, %p1205_p12 }
  0x21   :  { %p1208_p1 = pnand %p1207_p0, %p1201_p11 }
  0x23   :  { %1211 = shalt.err (!%p1208_p1)
}
  0x24   :  { %s1220_s0 = smov 256   ;;  %s1221_s22 = smov 16  }
  0x25   :  { %38 = dma.hbm_to_vmem [thread:$0]  %s1641_s1, 4096, %s33_s13, [#allocation6], %s1220_s0, %s1220_s0, %s1221_s22  }
  0x26   :  { %1212 = dma.done.wait [#allocation4], 256  }
  0x27   :  { %1213 = vsyncadd [#allocation4], 4294967040 }
  0x28   :  { %1214 = dma.done.wait [#allocation6], 4096  }
  0x29   :  { %1215 = vsyncadd [#allocation6], 4294963200  ;;  %v1222_v1 = vmov 0.0   ;;  %v1223_v2 = vmov 0   ;;  %v57_v3 = vld [vmem:[#allocation5 + $0x8] sm:$0xff]  ;;  %v59_v4 = vld [vmem:[#allocation5 + $0x18] sm:$0xff] }
  0x2a   :  { %164 = vmatprep.mubr.f32.mxu0 %v1222_v1  ;;  %314 = vmatprep.mubr.bf16.mxu1 %v1223_v2  ;;  %v1029_v5 = vpack.c.bf16 %v59_v4, %v57_v3  ;;  %v1294_v6 = vld [vmem:[%s1642_s2 + $0x4] ss:$8 sps:$4 sm:$0xff]   ;;  %v56_v7 = vld [vmem:[#allocation5] sm:$0xff]  ;;  %v1299_v9 = vld [vmem:[%s1642_s2] ss:$8 sps:$4 sm:$0xff]   ;;  %vm1226_vm1 = vmmov 0  }
  0x2b   :  { %v58_v8 = vld [vmem:[#allocation5 + $0x10] sm:$0xff]  ;;  %v61_v10 = vld [vmem:[#allocation5 + $0x28] sm:$0xff]  ;;  %282 = vmatprep.subr.bf16.mxu1 %v1294_v6  ;;  %v63_v12 = vld [vmem:[#allocation5 + $0x38] sm:$0xff]  ;;  %vm952_vm2 = vcmask 1024  }
  0x2c   :  { %1030 = vmatprep.subr.bf16.mxu0 %v1029_v5  ;;  %v1031_v11 = vpack.c.bf16 %v58_v8, %v56_v7  ;;  %283 = vmatpush1.bf16.msra.mxu1 %v1299_v9  ;;  %v1033_v13 = vpack.c.bf16 %v63_v12, %v61_v10  ;;  %v1306_v14 = vld [vmem:[%s1642_s2 + $0x14] ss:$8 sps:$4 sm:$0xff]   ;;  %v62_v16 = vld [vmem:[#allocation5 + $0x30] sm:$0xff]  ;;  %v1311_v18 = vld [vmem:[%s1642_s2 + $0x10] ss:$8 sps:$4 sm:$0xff]   ;;  %v90_v7 = vlaneseq }
  0x2d   :  { %v60_v15 = vld [vmem:[#allocation5 + $0x20] sm:$0xff]  ;;  %v65_v19 = vld [vmem:[#allocation5 + $0x48] sm:$0xff]  ;;  %v67_v20 = vld [vmem:[#allocation5 + $0x58] sm:$0xff]  ;;  %284 = vmatprep.subr.bf16.mxu1 %v1306_v14 }
  0x2e   :  { %1032 = vmatpush1.bf16.msra.mxu0 %v1031_v11  ;;  %v1035_v17 = vpack.c.bf16 %v62_v16, %v60_v15  ;;  %v1037_v21 = vpack.c.bf16 %v67_v20, %v65_v19  ;;  %v1317_v22 = vld [vmem:[%s1642_s2 + $0x24] ss:$8 sps:$4 sm:$0xff]   ;;  %v64_v23 = vld [vmem:[#allocation5 + $0x40] sm:$0xff]  ;;  %v1322_v25 = vld [vmem:[%s1642_s2 + $0x20] ss:$8 sps:$4 sm:$0xff]   ;;  %v91_v8 = vshrl.u32 %v90_v7, 7 }
  0x2f   :  { %1034 = vmatprep.subr.bf16.mxu0 %v1033_v13  ;;  %v66_v24 = vld [vmem:[#allocation5 + $0x50] sm:$0xff]  ;;  %v69_v26 = vld [vmem:[#allocation5 + $0x68] sm:$0xff]  ;;  %v71_v27 = vld [vmem:[#allocation5 + $0x78] sm:$0xff] }
  0x30   :  { %285 = vmatpush1.bf16.msra.mxu1 %v1311_v18  ;;  %v1039_v28 = vpack.c.bf16 %v66_v24, %v64_v23  ;;  %v1329_v29 = vld [vmem:[%s1642_s2 + $0x34] ss:$8 sps:$4 sm:$0xff]   ;;  %v1041_v30 = vpack.c.bf16 %v71_v27, %v69_v26  ;;  %v70_v32 = vld [vmem:[#allocation5 + $0x70] sm:$0xff]  ;;  %v75_v34 = vld [vmem:[#allocation5 + $0x98] sm:$0xff]  ;;  %v92_v10 = vsub.s32 0, %v91_v8  ;;  %v96_v12 = vsub.s32 1, %v91_v8 }
  0x31   :  { %286 = vmatprep.subr.bf16.mxu1 %v1317_v22  ;;  %v68_v31 = vld [vmem:[#allocation5 + $0x60] sm:$0xff]  ;;  %v73_v33 = vld [vmem:[#allocation5 + $0x88] sm:$0xff]  ;;  %v1341_v37 = vld [vmem:[%s1642_s2 + $0x44] ss:$8 sps:$4 sm:$0xff]  }
  0x32   :  { %1036 = vmatpush1.bf16.msra.mxu0 %v1035_v17  ;;  %v1335_v35 = vld [vmem:[%s1642_s2 + $0x30] ss:$8 sps:$4 sm:$0xff]   ;;  %v1043_v36 = vpack.c.bf16 %v70_v32, %v68_v31  ;;  %v1045_v39 = vpack.c.bf16 %v75_v34, %v73_v33  ;;  %v74_v40 = vld [vmem:[#allocation5 + $0x90] sm:$0xff]  ;;  %v1353_v45 = vld [vmem:[%s1642_s2 + $0x54] ss:$8 sps:$4 sm:$0xff]  }
  0x33   :  { %1038 = vmatprep.subr.bf16.mxu0 %v1037_v21  ;;  %v72_v38 = vld [vmem:[#allocation5 + $0x80] sm:$0xff]  ;;  %v77_v41 = vld [vmem:[#allocation5 + $0xa8] sm:$0xff]  ;;  %v79_v42 = vld [vmem:[#allocation5 + $0xb8] sm:$0xff] }
  0x34   :  { %287 = vmatpush1.bf16.msra.mxu1 %v1322_v25  ;;  %v1347_v43 = vld [vmem:[%s1642_s2 + $0x40] ss:$8 sps:$4 sm:$0xff]   ;;  %v1047_v44 = vpack.c.bf16 %v74_v40, %v72_v38  ;;  %v1049_v46 = vpack.c.bf16 %v79_v42, %v77_v41  ;;  %v76_v47 = vld [vmem:[#allocation5 + $0xa0] sm:$0xff]  ;;  %v1365_v53 = vld [vmem:[%s1642_s2 + $0x64] ss:$8 sps:$4 sm:$0xff]  }
  0x35   :  { %288 = vmatprep.subr.bf16.mxu1 %v1329_v29  ;;  %v78_v48 = vld [vmem:[#allocation5 + $0xb0] sm:$0xff]  ;;  %v81_v49 = vld [vmem:[#allocation5 + $0xc8] sm:$0xff]  ;;  %v83_v50 = vld [vmem:[#allocation5 + $0xd8] sm:$0xff] }
  0x36   :  { %1040 = vmatpush1.bf16.msra.mxu0 %v1039_v28  ;;  %v1359_v51 = vld [vmem:[%s1642_s2 + $0x50] ss:$8 sps:$4 sm:$0xff]   ;;  %v1051_v52 = vpack.c.bf16 %v78_v48, %v76_v47  ;;  %v1053_v54 = vpack.c.bf16 %v83_v50, %v81_v49  ;;  %v82_v56 = vld [vmem:[#allocation5 + $0xd0] sm:$0xff]  ;;  %v1377_v61 = vld [vmem:[%s1642_s2 + $0x74] ss:$8 sps:$4 sm:$0xff]  }
  0x37   :  { %1042 = vmatprep.subr.bf16.mxu0 %v1041_v30  ;;  %v80_v55 = vld [vmem:[#allocation5 + $0xc0] sm:$0xff]  ;;  %v85_v57 = vld [vmem:[#allocation5 + $0xe8] sm:$0xff]  ;;  %v87_v58 = vld [vmem:[#allocation5 + $0xf8] sm:$0xff]  ;;  %v178_v30 = vand.u32 127, %v90_v7 }
  0x38   :  { %289 = vmatpush1.bf16.msra.mxu1 %v1335_v35  ;;  %v1371_v59 = vld [vmem:[%s1642_s2 + $0x60] ss:$8 sps:$4 sm:$0xff]   ;;  %v1055_v60 = vpack.c.bf16 %v82_v56, %v80_v55  ;;  %v1057_v62 = vpack.c.bf16 %v87_v58, %v85_v57  ;;  %v84_v63 = vld [vmem:[#allocation5 + $0xe0] sm:$0xff] }
  0x39   :  { %290 = vmatprep.subr.bf16.mxu1 %v1341_v37  ;;  %v86_v0 = vld [vmem:[#allocation5 + $0xf0] sm:$0xff]  ;;  %v1383_v3 = vld [vmem:[%s1642_s2 + $0x70] ss:$8 sps:$4 sm:$0xff]   ;;  %v1439_v31 = vadd.s32 128, %v178_v30 }
  0x3a   :  { %1044 = vmatpush1.bf16.msra.mxu0 %v1043_v36  ;;  %v1059_v4 = vpack.c.bf16 %v86_v0, %v84_v63  ;;  %v54_v5 = vld [vmem:[#allocation3] sm:$0xff]  ;;  %v55_v40 = vld [vmem:[#allocation3 + $0x8] sm:$0xff] }
  0x3b   :  { %1046 = vmatprep.subr.bf16.mxu0 %v1045_v39  ;;  %v88_v11 = vld [vmem:[%s1643_s3] sm:$0x3]  ;;  %vm183_vm0 = vcmp.lt.s32.totalorder %v1439_v31, 192  ;;  %s1224_s3 = smov 64  }
  0x3c   :  { %291 = vmatpush1.bf16.msra.mxu1 %v1347_v43  ;;  %v1427_v13 = vrot.slane %v88_v11, %v92_v10  ;;  %v1429_v15 = vrot.slane %v88_v11, %v96_v12 }
  0x3d   :  { %292 = vmatprep.subr.bf16.mxu1 %v1353_v45 }
  0x3e   :  { %1048 = vmatpush1.bf16.msra.mxu0 %v1047_v44 }
  0x3f   :  { %1050 = vmatprep.subr.bf16.mxu0 %v1049_v46 }
  0x40   :  { %293 = vmatpush1.bf16.msra.mxu1 %v1359_v51 }
  0x41   :  { %294 = vmatprep.subr.bf16.mxu1 %v1365_v53 }
  0x42   :  { %1052 = vmatpush1.bf16.msra.mxu0 %v1051_v52 }
  0x43   :  { %1054 = vmatprep.subr.bf16.mxu0 %v1053_v54 }
  0x44   :  { %295 = vmatpush1.bf16.msra.mxu1 %v1371_v59 }
  0x45   :  { %296 = vmatprep.subr.bf16.mxu1 %v1377_v61 }
  0x46   :  { %1056 = vmatpush1.bf16.msra.mxu0 %v1055_v60 }
  0x47   :  { %1058 = vmatprep.subr.bf16.mxu0 %v1057_v62 }
  0x48   :  { %297 = vmatpush1.bf16.msra.mxu1 %v1383_v3 }
  0x49   :  { %419 = vmatprep.subr.bf16.mxu1 %v1294_v6 }
  0x4a   :  { %1060 = vmatpush1.bf16.msra.mxu0 %v1059_v4 }
  0x4b   :  { %343 = vmatprep.subr.bf16.mxu0 %v1294_v6  ;;  %315 = vmatmul.mubr.bf16.vlgmr.msra.gmra.mrb[0].mxu1 %v1223_v2 }
  0x4c   :  { %420 = vmatpush1.bf16.msra.mxu1 %v1299_v9  ;;  %451 = vmatprep.mubr.bf16.mxu1 %v1223_v2 }
  0x4d   :  { %165 = vmatmul.mubr.f32.vlgmr.msra.gmra.mrb[0].mxu0 %v54_v5  ;;  %421 = vmatprep.subr.bf16.mxu1 %v1306_v14 }
  0x4e   :  { %344 = vmatpush1.bf16.msra.mxu0 %v1299_v9  ;;  %170 = vmatprep.mubr.f32.mxu0 %v1222_v1 }
  0x4f   :  { %345 = vmatprep.subr.bf16.mxu0 %v1306_v14 }
  0x50   :  { %422 = vmatpush1.bf16.msra.mxu1 %v1311_v18 }
  0x51   :  { %423 = vmatprep.subr.bf16.mxu1 %v1317_v22  ;;  %171 = vmatmul.mubr.f32.gmra.mrb[2].mxu0 %v55_v40 }
  0x52   :  { %346 = vmatpush1.bf16.msra.mxu0 %v1311_v18  ;;  %375 = vmatprep.mubr.bf16.mxu0 %v1223_v2 }
  0x53   :  { %347 = vmatprep.subr.bf16.mxu0 %v1317_v22 }
  0x54   :  { %424 = vmatpush1.bf16.msra.mxu1 %v1322_v25 }
  0x55   :  { %425 = vmatprep.subr.bf16.mxu1 %v1329_v29 }
  0x56   :  { %348 = vmatpush1.bf16.msra.mxu0 %v1322_v25 }
  0x57   :  { %349 = vmatprep.subr.bf16.mxu0 %v1329_v29 }
  0x58   :  { %426 = vmatpush1.bf16.msra.mxu1 %v1335_v35 }
  0x59   :  { %427 = vmatprep.subr.bf16.mxu1 %v1341_v37 }
  0x5a   :  { %350 = vmatpush1.bf16.msra.mxu0 %v1335_v35 }
  0x5b   :  { %351 = vmatprep.subr.bf16.mxu0 %v1341_v37 }
  0x5c   :  { %428 = vmatpush1.bf16.msra.mxu1 %v1347_v43 }
  0x5d   :  { %429 = vmatprep.subr.bf16.mxu1 %v1353_v45 }
  0x5e   :  { %352 = vmatpush1.bf16.msra.mxu0 %v1347_v43 }
  0x5f   :  { %353 = vmatprep.subr.bf16.mxu0 %v1353_v45 }
  0x60   :  { %430 = vmatpush1.bf16.msra.mxu1 %v1359_v51 }
  0x61   :  { %431 = vmatprep.subr.bf16.mxu1 %v1365_v53 }
  0x62   :  { %354 = vmatpush1.bf16.msra.mxu0 %v1359_v51 }
  0x63   :  { %355 = vmatprep.subr.bf16.mxu0 %v1365_v53 }
  0x64   :  { %432 = vmatpush1.bf16.msra.mxu1 %v1371_v59 }
  0x65   :  { %433 = vmatprep.subr.bf16.mxu1 %v1377_v61 }
  0x66   :  { %356 = vmatpush1.bf16.msra.mxu0 %v1371_v59 }
  0x67   :  { %357 = vmatprep.subr.bf16.mxu0 %v1377_v61 }
  0x68   :  { %434 = vmatpush1.bf16.msra.mxu1 %v1383_v3 }
  0x69   :  { %571 = vmatprep.subr.bf16.mxu1 %v1294_v6 }
  0x6a   :  { %358 = vmatpush1.bf16.msra.mxu0 %v1383_v3 }
  0x6b   :  { %495 = vmatprep.subr.bf16.mxu0 %v1294_v6 }
 0x11e   :  { %v316_v16 = vpop.f32.mrb[0].mxu1 }
 0x11f   :  { %v318_v19 = vpop.f32.mrb[1].mxu1 }
 0x120   :  { %v166_v17 = vpop.f32.mrb[0].mxu0  ;;  %v320_v23 = vpop.f32.mrb[2].mxu1 }
 0x121   :  { %v1432_v20 = vadd.f32 %v166_v17, %v1427_v13  ;;  %v168_v21 = vpop.f32.mrb[1].mxu0  ;;  %v321_v26 = vpop.f32.mrb[3].mxu1 }
 0x122   :  { %v1435_v24 = vadd.f32 %v168_v21, %v1429_v15 }
 0x123   :  { %v323_v27 = vadd.f32 %v316_v16, %v1432_v20 }
 0x124   :  { %v324_v28 = vadd.f32 %v318_v19, %v1435_v24  ;;  %v1464_v54 = vpop.f32.mrb[2].mxu0 }
 0x125   :  { %1120 = vtanh.f32 %v323_v27  ;;  %v1466_v55 = vpop.f32.mrb[3].mxu0 }
 0x126   :  { %1122 = vtanh.f32 %v324_v28 }
 0x12f   :  { %v1121_v32 = vpop.eup %1120 }
 0x130   :  { %v1123_v33 = vpop.eup %1122  ;;  %v327_v34 = vmul.f32 0.5, %v1121_v32 }
 0x131   :  { %v328_v36 = vmul.f32 0.5, %v1123_v33 }
 0x132   :  { %v329_v38 = vadd.f32 0.5, %v327_v34 }
 0x133   :  { %v330_v39 = vadd.f32 0.5, %v328_v36 }
 0x134   :  { %333 = vrot.lane.b32.xlu0 %v329_v38, %s1224_s3 }
 0x135   :  { %v332_v41 = vsel %vm183_vm0, %v1123_v33, %v330_v39 }
 0x136   :  { %v338_v42 = vmul.f32 %v332_v41, %v329_v38 }
 0x138   :  { %335 = vrot.lane.b32.xlu0 %v332_v41, %s1224_s3 }
 0x1a6   :  { %v334_v44 = vpop.permute.xlu0 %333 }
 0x1a7   :  { %v337_v46 = vmul.f32 0.0, %v334_v44 }
 0x1a9   :  { %v339_v47 = vadd.f32 %v338_v42, %v337_v46 }
 0x1aa   :  { %v336_v49 = vpop.permute.xlu0 %335 }
 0x1ab   :  { %1124 = vtanh.f32 %v339_v47 }
 0x1b5   :  { %v1125_v48 = vpop.eup %1124 }
 0x1b6   :  { %v341_v50 = vmul.f32 %v1125_v48, %v336_v49 }
 0x1b8   :  { %v342_v52 = vpack.c.bf16 %v341_v50, %v341_v50 }
 0x1ba   :  { %376 = vmatmul.mubr.bf16.vlgmr.msra.gmra.mrb[4].mxu0 %v342_v52 }
 0x1bb   :  { %496 = vmatpush1.bf16.msra.mxu0 %v1299_v9  ;;  %527 = vmatprep.mubr.bf16.mxu0 %v1223_v2 }
 0x1bc   :  { %497 = vmatprep.subr.bf16.mxu0 %v1306_v14 }
 0x1bf   :  { %498 = vmatpush1.bf16.msra.mxu0 %v1311_v18 }
 0x1c0   :  { %499 = vmatprep.subr.bf16.mxu0 %v1317_v22 }
 0x1c3   :  { %500 = vmatpush1.bf16.msra.mxu0 %v1322_v25 }
 0x1c4   :  { %501 = vmatprep.subr.bf16.mxu0 %v1329_v29 }
 0x1c7   :  { %502 = vmatpush1.bf16.msra.mxu0 %v1335_v35 }
 0x1c8   :  { %503 = vmatprep.subr.bf16.mxu0 %v1341_v37 }
 0x1cb   :  { %504 = vmatpush1.bf16.msra.mxu0 %v1347_v43 }
 0x1cc   :  { %505 = vmatprep.subr.bf16.mxu0 %v1353_v45 }
 0x1cf   :  { %506 = vmatpush1.bf16.msra.mxu0 %v1359_v51 }
 0x1d0   :  { %507 = vmatprep.subr.bf16.mxu0 %v1365_v53 }
 0x1d3   :  { %508 = vmatpush1.bf16.msra.mxu0 %v1371_v59 }
 0x1d4   :  { %509 = vmatprep.subr.bf16.mxu0 %v1377_v61 }
 0x1d7   :  { %510 = vmatpush1.bf16.msra.mxu0 %v1383_v3 }
 0x1d8   :  { %632 = vmatprep.subr.bf16.mxu0 %v1294_v6 }
 0x28d   :  { %v377_v56 = vpop.f32.mrb[4].mxu0 }
 0x28e   :  { %v386_v57 = vrot.slane %v377_v56, 6  ;;  %v379_v58 = vpop.f32.mrb[5].mxu0 }
 0x28f   :  { %v387_v60 = vrot.slane %v379_v58, 6  ;;  %v381_v62 = vpop.f32.mrb[6].mxu0 }
 0x290   :  { %v390_v63 = vadd.f32 %v386_v57, %v1432_v20  ;;  %v382_v0 = vpop.f32.mrb[7].mxu0 }
 0x291   :  { %v391_v4 = vadd.f32 %v387_v60, %v1435_v24 }
 0x292   :  { %1126 = vtanh.f32 %v390_v63 }
 0x293   :  { %1128 = vtanh.f32 %v391_v4 }
 0x29c   :  { %v1127_v5 = vpop.eup %1126 }
 0x29d   :  { %v1129_v7 = vpop.eup %1128  ;;  %v394_v8 = vmul.f32 0.5, %v1127_v5 }
 0x29e   :  { %v395_v10 = vmul.f32 0.5, %v1129_v7 }
 0x29f   :  { %v396_v11 = vadd.f32 0.5, %v394_v8 }
 0x2a0   :  { %v397_v12 = vadd.f32 0.5, %v395_v10 }
 0x2a1   :  { %v401_v16 = vrot.slane %v396_v11, 2 }
 0x2a2   :  { %v399_v17 = vsel %vm183_vm0, %v1129_v7, %v397_v12 }
 0x2a3   :  { %403 = vrot.lane.b32.xlu1 %v401_v16, %s1224_s3  ;;  %v411_v19 = vmul.f32 %v399_v17, %v396_v11  ;;  %v406_v21 = vrot.slane %v399_v17, 2 }
 0x2a5   :  { %v413_v27 = vrot.slane %v411_v19, 2 }
 0x2a7   :  { %408 = vrot.lane.b32.xlu1 %v406_v21, %s1224_s3 }
 0x315   :  { %v404_v23 = vpop.permute.xlu1 %403 }
 0x316   :  { %v410_v26 = vmul.f32 %v404_v23, %v339_v47 }
 0x318   :  { %v415_v28 = vadd.f32 %v413_v27, %v410_v26 }
 0x319   :  { %v409_v32 = vpop.permute.xlu1 %408 }
 0x31a   :  { %1130 = vtanh.f32 %v415_v28 }
 0x324   :  { %v1131_v30 = vpop.eup %1130 }
 0x325   :  { %v417_v33 = vmul.f32 %v1131_v30, %v409_v32 }
 0x327   :  { %v418_v34 = vpack.c.bf16 %v417_v33, %v417_v33 }
 0x329   :  { %452 = vmatmul.mubr.bf16.vlgmr.msra.gmra.mrb[4].mxu1 %v418_v34 }
 0x32a   :  { %572 = vmatpush1.bf16.msra.mxu1 %v1299_v9  ;;  %603 = vmatprep.mubr.bf16.mxu1 %v1223_v2 }
 0x32b   :  { %573 = vmatprep.subr.bf16.mxu1 %v1306_v14 }
 0x32e   :  { %574 = vmatpush1.bf16.msra.mxu1 %v1311_v18 }
 0x32f   :  { %575 = vmatprep.subr.bf16.mxu1 %v1317_v22 }
 0x332   :  { %576 = vmatpush1.bf16.msra.mxu1 %v1322_v25 }
 0x333   :  { %577 = vmatprep.subr.bf16.mxu1 %v1329_v29 }
 0x336   :  { %578 = vmatpush1.bf16.msra.mxu1 %v1335_v35 }
 0x337   :  { %579 = vmatprep.subr.bf16.mxu1 %v1341_v37 }
 0x33a   :  { %580 = vmatpush1.bf16.msra.mxu1 %v1347_v43 }
 0x33b   :  { %581 = vmatprep.subr.bf16.mxu1 %v1353_v45 }
 0x33e   :  { %582 = vmatpush1.bf16.msra.mxu1 %v1359_v51 }
 0x33f   :  { %583 = vmatprep.subr.bf16.mxu1 %v1365_v53 }
 0x342   :  { %584 = vmatpush1.bf16.msra.mxu1 %v1371_v59 }
 0x343   :  { %585 = vmatprep.subr.bf16.mxu1 %v1377_v61 }
 0x346   :  { %586 = vmatpush1.bf16.msra.mxu1 %v1383_v3 }
 0x347   :  { %708 = vmatprep.subr.bf16.mxu1 %v1294_v6 }
 0x3fc   :  { %v453_v36 = vpop.f32.mrb[4].mxu1 }
 0x3fd   :  { %v462_v38 = vrot.slane %v453_v36, 4  ;;  %v455_v39 = vpop.f32.mrb[5].mxu1 }
 0x3fe   :  { %v463_v40 = vrot.slane %v455_v39, 4  ;;  %v457_v41 = vpop.f32.mrb[6].mxu1 }
 0x3ff   :  { %v466_v42 = vadd.f32 %v462_v38, %v1432_v20  ;;  %v458_v44 = vpop.f32.mrb[7].mxu1 }
 0x400   :  { %v467_v46 = vadd.f32 %v463_v40, %v1435_v24 }
 0x401   :  { %1132 = vtanh.f32 %v466_v42 }
 0x402   :  { %1134 = vtanh.f32 %v467_v46 }
 0x40b   :  { %v1133_v47 = vpop.eup %1132 }
 0x40c   :  { %v1135_v48 = vpop.eup %1134  ;;  %v470_v49 = vmul.f32 0.5, %v1133_v47 }
 0x40d   :  { %v471_v50 = vmul.f32 0.5, %v1135_v48 }
 0x40e   :  { %v472_v52 = vadd.f32 0.5, %v470_v49  ;;  %v1538_v49 = vadd.f32 %v1464_v54, %v1427_v13 }
 0x40f   :  { %v473_v56 = vadd.f32 0.5, %v471_v50  ;;  %v1542_v50 = vadd.f32 %v1466_v55, %v1429_v15 }
 0x410   :  { %v477_v57 = vrot.slane %v472_v52, 4 }
 0x411   :  { %v475_v58 = vsel %vm183_vm0, %v1135_v48, %v473_v56 }
 0x412   :  { %479 = vrot.lane.b32.xlu0 %v477_v57, %s1224_s3  ;;  %v482_v60 = vrot.slane %v475_v58, 4  ;;  %v487_v62 = vmul.f32 %v475_v58, %v472_v52 }
 0x414   :  { %484 = vrot.lane.b32.xlu1 %v482_v60, %s1224_s3  ;;  %v489_v4 = vrot.slane %v487_v62, 4 }
 0x484   :  { %v480_v63 = vpop.permute.xlu0 %479 }
 0x485   :  { %v486_v0 = vmul.f32 %v480_v63, %v415_v28 }
 0x486   :  { %v485_v8 = vpop.permute.xlu1 %484 }
 0x487   :  { %v491_v5 = vadd.f32 %v489_v4, %v486_v0 }
 0x489   :  { %1136 = vtanh.f32 %v491_v5 }
 0x493   :  { %v1137_v7 = vpop.eup %1136 }
 0x494   :  { %v493_v10 = vmul.f32 %v1137_v7, %v485_v8 }
 0x496   :  { %v494_v11 = vpack.c.bf16 %v493_v10, %v493_v10 }
 0x498   :  { %528 = vmatmul.mubr.bf16.vlgmr.msra.gmra.mrb[8].mxu0 %v494_v11 }
 0x499   :  { %633 = vmatpush1.bf16.msra.mxu0 %v1299_v9  ;;  %664 = vmatprep.mubr.bf16.mxu0 %v1223_v2 }
 0x49a   :  { %634 = vmatprep.subr.bf16.mxu0 %v1306_v14 }
 0x49d   :  { %635 = vmatpush1.bf16.msra.mxu0 %v1311_v18 }
 0x49e   :  { %636 = vmatprep.subr.bf16.mxu0 %v1317_v22 }
 0x4a1   :  { %637 = vmatpush1.bf16.msra.mxu0 %v1322_v25 }
 0x4a2   :  { %638 = vmatprep.subr.bf16.mxu0 %v1329_v29 }
 0x4a5   :  { %639 = vmatpush1.bf16.msra.mxu0 %v1335_v35 }
 0x4a6   :  { %640 = vmatprep.subr.bf16.mxu0 %v1341_v37 }
 0x4a9   :  { %641 = vmatpush1.bf16.msra.mxu0 %v1347_v43 }
 0x4aa   :  { %642 = vmatprep.subr.bf16.mxu0 %v1353_v45 }
 0x4ad   :  { %643 = vmatpush1.bf16.msra.mxu0 %v1359_v51 }
 0x4ae   :  { %644 = vmatprep.subr.bf16.mxu0 %v1365_v53 }
 0x4b1   :  { %645 = vmatpush1.bf16.msra.mxu0 %v1371_v59 }
 0x4b2   :  { %646 = vmatprep.subr.bf16.mxu0 %v1377_v61 }
 0x4b5   :  { %647 = vmatpush1.bf16.msra.mxu0 %v1383_v3 }
 0x4b6   :  { %784 = vmatprep.subr.bf16.mxu0 %v1294_v6 }
 0x56b   :  { %v529_v12 = vpop.f32.mrb[8].mxu0 }
 0x56c   :  { %v538_v16 = vrot.slane %v529_v12, 2  ;;  %v531_v17 = vpop.f32.mrb[9].mxu0 }
 0x56d   :  { %v539_v19 = vrot.slane %v531_v17, 2  ;;  %v533_v21 = vpop.f32.mrb[10].mxu0 }
 0x56e   :  { %v542_v23 = vadd.f32 %v538_v16, %v1432_v20  ;;  %v534_v26 = vpop.f32.mrb[11].mxu0 }
 0x56f   :  { %v543_v27 = vadd.f32 %v539_v19, %v1435_v24 }
 0x570   :  { %1138 = vtanh.f32 %v542_v23 }
 0x571   :  { %1140 = vtanh.f32 %v543_v27 }
 0x57a   :  { %v1139_v28 = vpop.eup %1138 }
 0x57b   :  { %v1141_v30 = vpop.eup %1140  ;;  %v546_v32 = vmul.f32 0.5, %v1139_v28 }
 0x57c   :  { %v547_v33 = vmul.f32 0.5, %v1141_v30 }
 0x57d   :  { %v548_v34 = vadd.f32 0.5, %v546_v32 }
 0x57e   :  { %v549_v36 = vadd.f32 0.5, %v547_v33 }
 0x57f   :  { %v553_v38 = vrot.slane %v548_v34, 6 }
 0x580   :  { %v551_v6 = vsel %vm183_vm0, %v1141_v30, %v549_v36 }
 0x581   :  { %555 = vrot.lane.b32.xlu0 %v553_v38, %s1224_s3  ;;  %v558_v39 = vrot.slane %v551_v6, 6  ;;  %v563_v40 = vmul.f32 %v551_v6, %v548_v34 }
 0x583   :  { %560 = vrot.lane.b32.xlu1 %v558_v39, %s1224_s3  ;;  %v565_v41 = vrot.slane %v563_v40, 6 }
 0x5f3   :  { %v556_v20 = vpop.permute.xlu0 %555 }
 0x5f4   :  { %v562_v24 = vmul.f32 %v556_v20, %v491_v5 }
 0x5f5   :  { %v561_v46 = vpop.permute.xlu1 %560 }
 0x5f6   :  { %v567_v42 = vadd.f32 %v565_v41, %v562_v24 }
 0x5f8   :  { %1142 = vtanh.f32 %v567_v42 }
 0x602   :  { %v1143_v44 = vpop.eup %1142 }
 0x603   :  { %v569_v47 = vmul.f32 %v1143_v44, %v561_v46 }
 0x605   :  { %v570_v48 = vpack.c.bf16 %v569_v47, %v569_v47 }
 0x607   :  { %604 = vmatmul.mubr.bf16.vlgmr.msra.gmra.mrb[8].mxu1 %v570_v48 }
 0x608   :  { %709 = vmatpush1.bf16.msra.mxu1 %v1299_v9  ;;  %740 = vmatprep.mubr.bf16.mxu1 %v1223_v2 }
 0x609   :  { %710 = vmatprep.subr.bf16.mxu1 %v1306_v14 }
 0x60c   :  { %711 = vmatpush1.bf16.msra.mxu1 %v1311_v18 }
 0x60d   :  { %712 = vmatprep.subr.bf16.mxu1 %v1317_v22 }
 0x610   :  { %713 = vmatpush1.bf16.msra.mxu1 %v1322_v25 }
 0x611   :  { %714 = vmatprep.subr.bf16.mxu1 %v1329_v29 }
 0x614   :  { %715 = vmatpush1.bf16.msra.mxu1 %v1335_v35 }
 0x615   :  { %716 = vmatprep.subr.bf16.mxu1 %v1341_v37 }
 0x618   :  { %717 = vmatpush1.bf16.msra.mxu1 %v1347_v43 }
 0x619   :  { %718 = vmatprep.subr.bf16.mxu1 %v1353_v45 }
 0x61c   :  { %719 = vmatpush1.bf16.msra.mxu1 %v1359_v51 }
 0x61d   :  { %720 = vmatprep.subr.bf16.mxu1 %v1365_v53 }
 0x620   :  { %721 = vmatpush1.bf16.msra.mxu1 %v1371_v59 }
 0x621   :  { %722 = vmatprep.subr.bf16.mxu1 %v1377_v61 }
 0x624   :  { %723 = vmatpush1.bf16.msra.mxu1 %v1383_v3 }
 0x6da   :  { %v605_v52 = vpop.f32.mrb[8].mxu1 }
 0x6db   :  { %v612_v56 = vadd.f32 %v605_v52, %v1538_v49  ;;  %v607_v57 = vpop.f32.mrb[9].mxu1 }
 0x6dc   :  { %v613_v58 = vadd.f32 %v607_v57, %v1542_v50  ;;  %v609_v60 = vpop.f32.mrb[10].mxu1 }
 0x6dd   :  { %1144 = vtanh.f32 %v612_v56  ;;  %v610_v62 = vpop.f32.mrb[11].mxu1 }
 0x6de   :  { %1146 = vtanh.f32 %v613_v58 }
 0x6e7   :  { %v1145_v63 = vpop.eup %1144 }
 0x6e8   :  { %v1147_v0 = vpop.eup %1146  ;;  %v616_v4 = vmul.f32 0.5, %v1145_v63 }
 0x6e9   :  { %v617_v5 = vmul.f32 0.5, %v1147_v0 }
 0x6ea   :  { %v618_v13 = vadd.f32 0.5, %v616_v4 }
 0x6eb   :  { %v619_v54 = vadd.f32 0.5, %v617_v5 }
 0x6ec   :  { %622 = vrot.lane.b32.xlu0 %v618_v13, %s1224_s3 }
 0x6ed   :  { %v621_v15 = vsel %vm183_vm0, %v1147_v0, %v619_v54 }
 0x6ee   :  { %624 = vrot.lane.b32.xlu1 %v621_v15, %s1224_s3  ;;  %v627_v55 = vmul.f32 %v621_v15, %v618_v13 }
 0x75e   :  { %v623_v7 = vpop.permute.xlu0 %622 }
 0x75f   :  { %v626_v8 = vmul.f32 %v623_v7, %v567_v42  ;;  %v860_v7 = vld [vmem:[%s1644_s4 + $0x8] sm:$0xff] }
 0x760   :  { %v625_v12 = vpop.permute.xlu1 %624 }
 0x761   :  { %v628_v10 = vadd.f32 %v627_v55, %v626_v8  ;;  %v859_v55 = vld [vmem:[%s1644_s4] sm:$0xff]  ;;  %v861_v8 = vld [vmem:[%s1644_s4 + $0x10] sm:$0xff] }
 0x763   :  { %1148 = vtanh.f32 %v628_v10 }
 0x76d   :  { %v1149_v11 = vpop.eup %1148 }
 0x76e   :  { %v630_v16 = vmul.f32 %v1149_v11, %v625_v12  ;;  %v1062_v11 = vpack.c.bf16 %v860_v7, %v859_v55  ;;  %v862_v12 = vld [vmem:[%s1644_s4 + $0x18] sm:$0xff] }
 0x770   :  { %v631_v17 = vpack.c.bf16 %v630_v16, %v630_v16  ;;  %v1065_v16 = vpack.c.bf16 %v862_v12, %v861_v8 }
 0x772   :  { %665 = vmatmul.mubr.bf16.vlgmr.msra.gmra.mrb[12].mxu0 %v631_v17  ;;  %v863_v17 = vld [vmem:[%s1644_s4 + $0x20] sm:$0xff] }
 0x773   :  { %785 = vmatpush1.bf16.msra.mxu0 %v1299_v9  ;;  %816 = vmatprep.mubr.bf16.mxu0 %v1223_v2 }
 0x774   :  { %786 = vmatprep.subr.bf16.mxu0 %v1306_v14 }
 0x777   :  { %787 = vmatpush1.bf16.msra.mxu0 %v1311_v18 }
 0x778   :  { %788 = vmatprep.subr.bf16.mxu0 %v1317_v22 }
 0x77b   :  { %789 = vmatpush1.bf16.msra.mxu0 %v1322_v25 }
 0x77c   :  { %790 = vmatprep.subr.bf16.mxu0 %v1329_v29 }
 0x77f   :  { %791 = vmatpush1.bf16.msra.mxu0 %v1335_v35 }
 0x780   :  { %792 = vmatprep.subr.bf16.mxu0 %v1341_v37 }
 0x783   :  { %793 = vmatpush1.bf16.msra.mxu0 %v1347_v43 }
 0x784   :  { %794 = vmatprep.subr.bf16.mxu0 %v1353_v45 }
 0x787   :  { %795 = vmatpush1.bf16.msra.mxu0 %v1359_v51 }
 0x788   :  { %796 = vmatprep.subr.bf16.mxu0 %v1365_v53 }
 0x78b   :  { %797 = vmatpush1.bf16.msra.mxu0 %v1371_v59 }
 0x78c   :  { %798 = vmatprep.subr.bf16.mxu0 %v1377_v61 }
 0x78f   :  { %799 = vmatpush1.bf16.msra.mxu0 %v1383_v3 }
 0x845   :  { %v666_v2 = vpop.f32.mrb[12].mxu0 }
 0x846   :  { %v675_v9 = vrot.slane %v666_v2, 6  ;;  %v668_v14 = vpop.f32.mrb[13].mxu0  ;;  %v864_v2 = vld [vmem:[%s1644_s4 + $0x28] sm:$0xff] }
 0x847   :  { %v676_v18 = vrot.slane %v668_v14, 6  ;;  %v670_v22 = vpop.f32.mrb[14].mxu0  ;;  %v865_v14 = vld [vmem:[%s1644_s4 + $0x30] sm:$0xff] }
 0x848   :  { %v679_v25 = vadd.f32 %v675_v9, %v1538_v49  ;;  %v671_v29 = vpop.f32.mrb[15].mxu0  ;;  %v1068_v9 = vpack.c.bf16 %v864_v2, %v863_v17 }
 0x849   :  { %v680_v35 = vadd.f32 %v676_v18, %v1542_v50  ;;  %v866_v18 = vld [vmem:[%s1644_s4 + $0x38] sm:$0xff] }
 0x84a   :  { %1150 = vtanh.f32 %v679_v25  ;;  %v1071_v22 = vpack.c.bf16 %v866_v18, %v865_v14 }
 0x84b   :  { %1152 = vtanh.f32 %v680_v35 }
 0x854   :  { %v1151_v37 = vpop.eup %1150 }
 0x855   :  { %v1153_v43 = vpop.eup %1152  ;;  %v683_v45 = vmul.f32 0.5, %v1151_v37 }
 0x856   :  { %v684_v51 = vmul.f32 0.5, %v1153_v43 }
 0x857   :  { %v685_v53 = vadd.f32 0.5, %v683_v45 }
 0x858   :  { %v686_v59 = vadd.f32 0.5, %v684_v51 }
 0x859   :  { %v690_v61 = vrot.slane %v685_v53, 2 }
 0x85a   :  { %v688_v3 = vsel %vm183_vm0, %v1153_v43, %v686_v59  ;;  %v867_v59 = vld [vmem:[%s1644_s4 + $0x40] sm:$0xff] }
 0x85b   :  { %692 = vrot.lane.b32.xlu0 %v690_v61, %s1224_s3  ;;  %v695_v19 = vrot.slane %v688_v3, 2  ;;  %v700_v21 = vmul.f32 %v688_v3, %v685_v53  ;;  %v868_v61 = vld [vmem:[%s1644_s4 + $0x48] sm:$0xff] }
 0x85c   :  { %v1074_v3 = vpack.c.bf16 %v868_v61, %v867_v59 }
 0x85d   :  { %697 = vrot.lane.b32.xlu1 %v695_v19, %s1224_s3  ;;  %v702_v27 = vrot.slane %v700_v21, 2 }
 0x8cd   :  { %v693_v23 = vpop.permute.xlu0 %692 }
 0x8ce   :  { %v699_v26 = vmul.f32 %v693_v23, %v628_v10  ;;  %v1225_v10 = vmov 0.0|0.0  }
 0x8cf   :  { %v698_v32 = vpop.permute.xlu1 %697  ;;  %1061 = vmatprep.subr.bf16.mxu1 %v1225_v10 }
 0x8d0   :  { %v704_v28 = vadd.f32 %v702_v27, %v699_v26  ;;  %v871_v27 = vld [vmem:[%s1644_s4 + $0x60] sm:$0xff] }
 0x8d2   :  { %1154 = vtanh.f32 %v704_v28 }
 0x8dc   :  { %v1155_v30 = vpop.eup %1154 }
 0x8dd   :  { %v706_v33 = vmul.f32 %v1155_v30, %v698_v32 }
 0x8df   :  { %v707_v34 = vpack.c.bf16 %v706_v33, %v706_v33 }
 0x8e1   :  { %741 = vmatmul.mubr.bf16.vlgmr.msra.gmra.mrb[12].mxu1 %v707_v34 }
 0x8e2   :  { %1063 = vmatpush3.bf16.msra.mxu1 %v1062_v11  ;;  %1026 = vmatprep.mubr.msk.f32.mxu1 %vm1226_vm1, %v1222_v1 }
 0x8e3   :  { %1064 = vmatprep.subr.bf16.mxu1 %v1225_v10 }
 0x8e6   :  { %1066 = vmatpush3.bf16.msra.mxu1 %v1065_v16 }
 0x8e7   :  { %1067 = vmatprep.subr.bf16.mxu1 %v1225_v10 }
 0x8ea   :  { %1069 = vmatpush3.bf16.msra.mxu1 %v1068_v9 }
 0x8eb   :  { %1070 = vmatprep.subr.bf16.mxu1 %v1225_v10 }
 0x8ee   :  { %1072 = vmatpush3.bf16.msra.mxu1 %v1071_v22 }
 0x8ef   :  { %1073 = vmatprep.subr.bf16.mxu1 %v1225_v10 }
 0x8f2   :  { %1075 = vmatpush3.bf16.msra.mxu1 %v1074_v3 }
 0x8f3   :  { %1076 = vmatprep.subr.bf16.mxu1 %v1225_v10 }
 0x9b4   :  { %v742_v36 = vpop.f32.mrb[12].mxu1 }
 0x9b5   :  { %v751_v38 = vrot.slane %v742_v36, 4  ;;  %v744_v6 = vpop.f32.mrb[13].mxu1 }
 0x9b6   :  { %v752_v39 = vrot.slane %v744_v6, 4  ;;  %v746_v40 = vpop.f32.mrb[14].mxu1  ;;  %v874_v6 = vld [vmem:[%s1644_s4 + $0x78] sm:$0xff] }
 0x9b7   :  { %v755_v20 = vadd.f32 %v751_v38, %v1538_v49  ;;  %v747_v24 = vpop.f32.mrb[15].mxu1  ;;  %v873_v38 = vld [vmem:[%s1644_s4 + $0x70] sm:$0xff] }
 0x9b8   :  { %v756_v41 = vadd.f32 %v752_v39, %v1542_v50  ;;  %v1083_v40 = vpack.c.bf16 %v874_v6, %v873_v38 }
 0x9b9   :  { %1156 = vtanh.f32 %v755_v20 }
 0x9ba   :  { %1158 = vtanh.f32 %v756_v41 }
 0x9c3   :  { %v1157_v42 = vpop.eup %1156 }
 0x9c4   :  { %v1159_v44 = vpop.eup %1158  ;;  %v759_v46 = vmul.f32 0.5, %v1157_v42 }
 0x9c5   :  { %v760_v47 = vmul.f32 0.5, %v1159_v44 }
 0x9c6   :  { %v761_v48 = vadd.f32 0.5, %v759_v46 }
 0x9c7   :  { %v762_v52 = vadd.f32 0.5, %v760_v47 }
 0x9c8   :  { %v766_v56 = vrot.slane %v761_v48, 4 }
 0x9c9   :  { %v764_v57 = vsel %vm183_vm0, %v1159_v44, %v762_v52  ;;  %v976_v52 = vld [vmem:[#allocation2] ss:$0 sm:$0xff] }
 0x9ca   :  { %768 = vrot.lane.b32.xlu0 %v766_v56, %s1224_s3  ;;  %v771_v58 = vrot.slane %v764_v57, 4  ;;  %v776_v60 = vmul.f32 %v764_v57, %v761_v48 }
 0x9cc   :  { %773 = vrot.lane.b32.xlu1 %v771_v58, %s1224_s3  ;;  %v778_v0 = vrot.slane %v776_v60, 4 }
 0xa3c   :  { %v769_v62 = vpop.permute.xlu0 %768 }
 0xa3d   :  { %v775_v63 = vmul.f32 %v769_v62, %v704_v28  ;;  %v872_v28 = vld [vmem:[%s1644_s4 + $0x68] sm:$0xff] }
 0xa3e   :  { %v774_v13 = vpop.permute.xlu1 %773  ;;  %v1080_v32 = vpack.c.bf16 %v872_v28, %v871_v27 }
 0xa3f   :  { %v1578_v4 = vadd.f32 %v778_v0, %v775_v63 }
 0xa41   :  { %1160 = vtanh.f32 %v1578_v4 }
 0xa4b   :  { %v1161_v5 = vpop.eup %1160 }
 0xa4c   :  { %v782_v54 = vmul.f32 %v1161_v5, %v774_v13 }
 0xa4e   :  { %v783_v15 = vpack.c.bf16 %v782_v54, %v782_v54 }
 0xa50   :  { %817 = vmatmul.mubr.bf16.vlgmr.msra.gmra.mrb[16].mxu0 %v783_v15 }
 0xb23   :  { %v818_v25 = vpop.f32.mrb[16].mxu0 }
 0xb24   :  { %v827_v29 = vrot.slane %v818_v25, 2  ;;  %v820_v35 = vpop.f32.mrb[17].mxu0 }
 0xb25   :  { %v828_v37 = vrot.slane %v820_v35, 2  ;;  %v822_v43 = vpop.f32.mrb[18].mxu0 }
 0xb26   :  { %v831_v45 = vadd.f32 %v827_v29, %v1538_v49  ;;  %v823_v51 = vpop.f32.mrb[19].mxu0  ;;  %v869_v49 = vld [vmem:[%s1644_s4 + $0x50] sm:$0xff] }
 0xb27   :  { %v832_v53 = vadd.f32 %v828_v37, %v1542_v50  ;;  %v870_v50 = vld [vmem:[%s1644_s4 + $0x58] sm:$0xff] }
 0xb28   :  { %1162 = vtanh.f32 %v831_v45  ;;  %v1077_v19 = vpack.c.bf16 %v870_v50, %v869_v49 }
 0xb29   :  { %1164 = vtanh.f32 %v832_v53 }
 0xb2a   :  { %1078 = vmatpush3.bf16.msra.mxu1 %v1077_v19 }
 0xb2b   :  { %1079 = vmatprep.subr.bf16.mxu1 %v1225_v10 }
 0xb2e   :  { %1081 = vmatpush3.bf16.msra.mxu1 %v1080_v32 }
 0xb2f   :  { %1082 = vmatprep.subr.bf16.mxu1 %v1225_v10 }
 0xb32   :  { %v1163_v21 = vpop.eup %1162  ;;  %1084 = vmatpush3.bf16.msra.mxu1 %v1083_v40 }
 0xb33   :  { %v1165_v23 = vpop.eup %1164  ;;  %v835_v26 = vmul.f32 0.5, %v1163_v21 }
 0xb34   :  { %v836_v30 = vmul.f32 0.5, %v1165_v23 }
 0xb35   :  { %v837_v33 = vadd.f32 0.5, %v835_v26 }
 0xb36   :  { %v838_v34 = vadd.f32 0.5, %v836_v30 }
 0xb37   :  { %v842_v36 = vrot.slane %v837_v33, 6 }
 0xb38   :  { %v840_v39 = vsel %vm183_vm0, %v1165_v23, %v838_v34 }
 0xb39   :  { %844 = vrot.lane.b32.xlu0 %v842_v36, %s1224_s3  ;;  %v847_v20 = vrot.slane %v840_v39, 6  ;;  %v852_v24 = vmul.f32 %v840_v39, %v837_v33 }
 0xb3b   :  { %849 = vrot.lane.b32.xlu1 %v847_v20, %s1224_s3  ;;  %v854_v44 = vrot.slane %v852_v24, 6 }
 0xbab   :  { %v845_v41 = vpop.permute.xlu0 %844 }
 0xbac   :  { %v851_v42 = vmul.f32 %v845_v41, %v1578_v4 }
 0xbad   :  { %v850_v31 = vpop.permute.xlu1 %849 }
 0xbae   :  { %v856_v46 = vadd.f32 %v854_v44, %v851_v42 }
 0xbb0   :  { %1166 = vtanh.f32 %v856_v46 }
 0xbba   :  { %v1167_v47 = vpop.eup %1166 }
 0xbbb   :  { %v858_v48 = vmul.f32 %v1167_v47, %v850_v31 }
 0xbbd   :  { %1027 = vmatmul.mubr.f32.vlgmr.msra.gmra.mrb[16].mxu1 %v858_v48 }
 0xc90   :  { %v948_v56 = vpop.f32.mrb[16].mxu1 }
 0xc91   :  { %v949_v57 = vadd.f32 %v976_v52, %v948_v56  ;;  %v1028_v58 = vpop.f32.mrb[17].mxu1 }
 0xc93   :  { %953 = vst.msk [vmem:[%s1646_s6] sm:$0x3] %vm952_vm2, %v949_v57 }
 0xc94   :  { %958 = vsyncpa [#allocation4], 1 }
 0xc95   :  { %959 = vsyncpa [#allocation6], 1 }

</bundles_post_ra>
